<compile_context>
chip_gen: v5e
topology: v5e:2x2
jax: 0.10.0
libtpu: 0.0.40
codegen_flags: <defaults>
</compile_context>

<pallas_src>
import functools

import jax
import jax.numpy as jnp
from jax import lax
from jax.experimental import pallas as pl
from jax.experimental.pallas import tpu as pltpu


def _boundary_sum(min_ind, axis):
    """Count positions where the int32 argmin map changes along `axis`.

    Equivalent to torch's (ind[1:] != ind[:-1]).float().sum() along that axis.
    When the axis is tile-aligned for the 32-bit layout (8 sublanes / 128 lanes)
    we compare against a pltpu.roll of the map (stays in full aligned vregs and
    the rotation runs on the XLU slot) instead of materialising misaligned
    (N-1, N) / (N, N-1) slices.  Callers must pass int32 (upcast packed argmin
    maps first) so the 8/128 tile check matches the actual layout.
    """
    n = min_ind.shape[axis]
    if n < 2:
        return jnp.float32(0.0)
    tile = 8 if axis == 0 else 128
    if n % tile == 0:
        shifted = pltpu.roll(min_ind, shift=1, axis=axis)      # shifted[i] = ind[i-1]
        pos = lax.broadcasted_iota(jnp.int32, min_ind.shape, axis)
        neq = jnp.logical_and(min_ind != shifted, pos >= 1)    # drop wrapped row/col
    else:
        # Small / unaligned fallback: shifted-slice compare (known-good path).
        if axis == 0:
            neq = min_ind[1:, :] != min_ind[:-1, :]
        else:
            neq = min_ind[:, 1:] != min_ind[:, :-1]
    return jnp.sum(neq.astype(jnp.float32))


def _accumulate_gram(x_ref, g_acc, i, num_k, inv_norm):
    """Phase 1: accumulate G = X @ X^T over K tiles; fold 1/(N*M) on the last tile."""

    @pl.when(i < num_k)
    def _():
        x = x_ref[...]                                         # (N, TK) bf16/f32 tile
        prod = lax.dot_general(                                # MXU, f32 accumulation
            x, x, (((1,), (1,)), ((), ())),
            preferred_element_type=jnp.float32)

        @pl.when(i == 0)
        def _():
            g_acc[...] = prod                                  # first tile: direct write

        @pl.when(i > 0)
        def _():
            g_acc[...] += prod

        @pl.when(i == num_k - 1)
        def _():
            g_acc[...] = g_acc[...] * inv_norm                 # fold normalisation once


def _fused_kernel(x_ref, tgt_ref, loss_ref, g_acc, *, inv_norm, num_k, num_t):
    """Small-T path: all targets parked in VMEM; epilogue runs in the last K step."""
    i = pl.program_id(0)
    _accumulate_gram(x_ref, g_acc, i, num_k, inv_norm)

    @pl.when(i == num_k - 1)
    def _():
        G = g_acc[...]                                         # (N, N), normalised
        min_val = (G - tgt_ref[0].astype(jnp.float32)) ** 2
        min_ind = jnp.zeros(G.shape, jnp.int32)
        for t in range(1, num_t):                              # small T: fully unrolled
            d = (G - tgt_ref[t].astype(jnp.float32)) ** 2
            better = d < min_val                               # strict '<': lowest idx wins
            min_val = jnp.where(better, d, min_val)
            min_ind = jnp.where(better, t, min_ind)
        loss_ref[0, 0] = (jnp.sum(min_val)
                          + _boundary_sum(min_ind, axis=0)
                          + _boundary_sum(min_ind, axis=1))


def _streamed_kernel(x_ref, tgt_ref, loss_ref, g_acc, minval_ref, minind_ref,
                     *, inv_norm, num_k, num_t):
    """Large-T path: one target gram per grid step, running min / argmin in VMEM."""
    i = pl.program_id(0)
    _accumulate_gram(x_ref, g_acc, i, num_k, inv_norm)

    @pl.when(i >= num_k)
    def _():
        t = i - num_k                                          # target index
        d = (g_acc[...] - tgt_ref[0].astype(jnp.float32)) ** 2

        @pl.when(t == 0)
        def _():
            minval_ref[...] = d
            minind_ref[...] = jnp.zeros_like(minind_ref)

        @pl.when(t > 0)
        def _():
            better = d < minval_ref[...]                       # strict '<': lowest idx wins
            minval_ref[...] = jnp.where(better, d, minval_ref[...])
            minind_ref[...] = jnp.where(better, t.astype(minind_ref.dtype),
                                        minind_ref[...])

        # Final step: argmin-boundary counts + scalar loss.
        @pl.when(t == num_t - 1)
        def _():
            mi = minind_ref[...].astype(jnp.int32)             # unpack int8 -> int32
            loss_ref[0, 0] = (jnp.sum(minval_ref[...])
                              + _boundary_sum(mi, axis=0)
                              + _boundary_sum(mi, axis=1))


def gram_matrix(x):
    a, b, c, d = x.shape
    f = x.reshape(a * b, c * d)
    return (f @ f.T) / (a * b * c * d)


def _round_up(v, mult):
    return ((v + mult - 1) // mult) * mult


def _tpu_budgets():
    """(x-tile double-buffer budget, total vmem_limit cap) per TPU generation."""
    try:
        vmem_cap = int(pltpu.get_tpu_info().vmem_capacity_bytes)
    except Exception:                                          # conservative fallback
        vmem_cap = 64 << 20
    if vmem_cap >= (96 << 20):        # v5e / v6e class: 128 MiB physical VMEM
        return 24 << 20, 100 << 20
    return 12 << 20, 52 << 20         # v7x class: 64 MiB physical VMEM


def _pick_tk(n_rows, m_pad, itemsize, budget_bytes):
    """Largest K tile (multiple of 128, divides m_pad) whose double-buffer fits."""
    cap = budget_bytes // (2 * itemsize * max(n_rows, 1))
    cap = max(128, (cap // 128) * 128)
    tk = min(m_pad, cap)
    while tk > 128 and m_pad % tk != 0:
        tk -= 128
    return tk


class StyleLossMin:
    """JAX/Pallas port of StyleLoss_Min.

    __call__ returns its input unchanged; the scalar loss is stored on self.loss
    (same semantics as the torch module).  By default the feature matrix and the
    target gram matrices are streamed in bfloat16 (with f32 MXU accumulation):
    ~2x fewer HBM bytes on v6e/v7x and ~4x faster gram on v5e.  Argmin
    tie-breaking / boundary counts are precision sensitive, so pass
    compute_dtype=jnp.float32 for f32-faithful behaviour.
    """

    def __init__(self, target_features, compute_dtype=jnp.bfloat16):
        self.compute_dtype = jnp.dtype(compute_dtype)
        # __init__-time gram matrices of the (detached) targets: plain JAX glue.
        grams = [gram_matrix(jnp.asarray(t, jnp.float32)) for t in target_features]
        self.targets_all = jnp.stack(grams, 0).astype(self.compute_dtype)

    def __call__(self, x, *, tk=None, phase2_mode="auto"):
        assert phase2_mode in ("auto", "fused", "streamed")
        a, b, c, d = x.shape
        n, m = a * b, c * d
        inv_norm = 1.0 / float(n * m)                  # torch divides by a*b*c*d
        cdt = self.compute_dtype
        xbytes = cdt.itemsize

        x_flat = jnp.asarray(x).astype(cdt).reshape(n, m)
        m_pad = _round_up(m, 128)
        if m_pad != m:                                 # zero-pad K: no-op for X @ X^T
            x_flat = jnp.pad(x_flat, ((0, 0), (0, m_pad - m)))

        tgt = self.targets_all                         # (T, N, N) in compute dtype
        num_t = int(tgt.shape[0])
        tbytes = tgt.dtype.itemsize

        minind_dtype = jnp.int8 if num_t <= 127 else jnp.int32
        minind_bytes = jnp.dtype(minind_dtype).itemsize

        if phase2_mode == "fused":
            fused = True
        elif phase2_mode == "streamed":
            fused = False
        else:
            # Fuse when the (double-buffered) target grams are cheap to park and
            # the unrolled min/argmin loop stays small; stream otherwise.
            fused = (2 * num_t * n * n * tbytes <= (8 << 20)) and num_t <= 64

        xtile_budget, vmem_cap = _tpu_budgets()

        # Fixed VMEM (everything except the X-tile double buffer), incl. headroom
        # for epilogue temporaries (d / better / roll / iota live values).
        if fused:
            fixed_vmem = 2 * num_t * n * n * tbytes + 4 * n * n + 7 * 4 * n * n
        else:
            fixed_vmem = (2 * n * n * tbytes + 2 * 4 * n * n
                          + n * n * minind_bytes + 6 * 4 * n * n)
        slack = 2 << 20
        x_budget = min(xtile_budget,
                       max(vmem_cap - fixed_vmem - slack, 2 * 128 * n * xbytes))
        if tk is None:
            tk = _pick_tk(n, m_pad, xbytes, x_budget)
        assert m_pad % tk == 0 and tk % 128 == 0, (m_pad, tk)
        num_k = m_pad // tk
        vmem_limit = int(min(max(fixed_vmem + 2 * n * tk * xbytes + slack, 16 << 20),
                             vmem_cap))

        if fused:
            grid = (num_k,)
            kernel = functools.partial(_fused_kernel, inv_norm=inv_norm,
                                       num_k=num_k, num_t=num_t)
            in_specs = [
                pl.BlockSpec((n, tk), lambda i: (0, i)),
                # Constant block index: all T target grams are DMA'd exactly once
                # (overlapped with phase-1 MXU work), then stay parked in VMEM.
                pl.BlockSpec((num_t, n, n), lambda i: (0, 0, 0)),
            ]
            scratch = [pltpu.VMEM((n, n), jnp.float32)]        # gram accumulator
        else:
            grid = (num_k + num_t,)
            kernel = functools.partial(_streamed_kernel, inv_norm=inv_norm,
                                       num_k=num_k, num_t=num_t)
            in_specs = [
                # Walks K during phase 1, then parks on the last tile (no re-DMA).
                pl.BlockSpec((n, tk), lambda i: (0, jnp.minimum(i, num_k - 1))),
                # One target gram per phase-2 step (parked on target 0 before).
                pl.BlockSpec((1, n, n), lambda i: (jnp.maximum(i - num_k, 0), 0, 0)),
            ]
            scratch = [
                pltpu.VMEM((n, n), jnp.float32),   # gram accumulator
                pltpu.VMEM((n, n), jnp.float32),   # running min value
                pltpu.VMEM((n, n), minind_dtype),  # running argmin (int8 if T <= 127)
            ]

        loss = pl.pallas_call(
            kernel,
            out_shape=jax.ShapeDtypeStruct((1, 1), jnp.float32),
            grid_spec=pltpu.PrefetchScalarGridSpec(
                num_scalar_prefetch=0,
                grid=grid,
                in_specs=in_specs,
                out_specs=pl.BlockSpec((1, 1), lambda i: (0, 0),
                                       memory_space=pltpu.MemorySpace.SMEM),
                scratch_shapes=scratch,
            ),
            compiler_params=pltpu.CompilerParams(
                dimension_semantics=("arbitrary",),
                vmem_limit_bytes=vmem_limit),
            cost_estimate=pl.CostEstimate(
                flops=2 * n * n * m_pad + 4 * num_t * n * n,
                transcendentals=0,
                bytes_accessed=xbytes * n * m_pad + tbytes * num_t * n * n + 4),
        )(x_flat, tgt)

        self.loss = loss[0, 0]
        return x


def ref_loss(x, targets_all, compute_dtype=jnp.float32):
    """Pure-JAX reference of the torch forward (same casts as the kernel path)."""
    xc = jnp.asarray(x).astype(compute_dtype).astype(jnp.float32)
    G = gram_matrix(xc)
    t = targets_all.astype(jnp.float32)
    diff = (G[None, :, :] - t) ** 2
    mv = jnp.min(diff, 0)
    mi = jnp.argmin(diff, 0)
    vert = (mi[1:, :] != mi[:-1, :]).astype(jnp.float32)
    horiz = (mi[:, 1:] != mi[:, :-1]).astype(jnp.float32)
    return jnp.sum(mv) + jnp.sum(vert) + jnp.sum(horiz)


if __name__ == "__main__":
    key = jax.random.PRNGKey(0)
    k_tgt, k_x = jax.random.split(key)

    # Small but tile-aligned shapes: N = a*b = 128 gram rows, M = c*d = 256
    # features, T = 3 target feature maps.  Values are quantized to multiples of
    # 1/8 so the bf16 casts and the f32-accumulated gram matrices are exact
    # regardless of accumulation order / MXU precision; this keeps the argmin map
    # (and hence the integer boundary counts) deterministic and directly
    # comparable with the pure-JAX reference.
    a, b, c, d = 2, 64, 16, 16
    T = 3

    def q(v):
        return jnp.round(v * 8.0) / 8.0

    target_features = q(jax.random.normal(k_tgt, (T, a, b, c, d), jnp.float32))
    x = q(jax.random.normal(k_x, (a, b, c, d), jnp.float32))

    # Default path: bf16 streaming, auto -> fused phase 2 (targets are tiny).
    module = StyleLossMin([target_features[t] for t in range(T)])
    out = module(x)
    loss_fused = jax.block_until_ready(module.loss)
    out = jax.block_until_ready(out)
    expected = ref_loss(x, module.targets_all, compute_dtype=jnp.bfloat16)
    assert out.shape == x.shape
    assert jnp.allclose(out, x)
    assert jnp.allclose(loss_fused, expected, rtol=1e-5, atol=1e-2), (loss_fused, expected)

    # Streamed phase 2 + multi-tile K accumulation (tk=128 -> 2 K tiles, int8 argmin).
    module(x, tk=128, phase2_mode="streamed")
    loss_streamed = jax.block_until_ready(module.loss)
    assert jnp.allclose(loss_streamed, expected, rtol=1e-5, atol=1e-2), (
        loss_streamed, expected)

    # f32 path, T = 1: boundary terms vanish -> tight check of the MSE-min path.
    module1 = StyleLossMin([target_features[0]], compute_dtype=jnp.float32)
    module1(x, tk=128, phase2_mode="streamed")
    loss1 = jax.block_until_ready(module1.loss)
    expected1 = ref_loss(x, module1.targets_all, compute_dtype=jnp.float32)
    assert jnp.allclose(loss1, expected1, rtol=1e-4, atol=1e-6), (loss1, expected1)

    print("KERNEL_OK")
</pallas_src>

<mosaic_0001>
module attributes {stable_mosaic.version = 11 : i64} {
  func.func @_fused_kernel(%arg0: i32, %arg1: memref<128x256xbf16, #tpu.memory_space<vmem>>, %arg2: memref<3x128x128xbf16, #tpu.memory_space<vmem>>, %arg3: memref<1x1xf32, #tpu.memory_space<smem>>, %arg4: memref<128x128xf32, #tpu.memory_space<vmem>>) attributes {dimension_semantics = [#tpu.dimension_semantics<arbitrary>], iteration_bounds = array<i64: 1>, scalar_prefetch = 0 : i64, scratch_operands = 1 : i64, tpu.core_type = #tpu.core_type<tc>, window_params = [{transform_indices = @transform_0, window_bounds = array<i64: 128, 256>}, {pipeline_mode = #tpu.pipeline_mode<synchronous>, transform_indices = @transform_1, window_bounds = array<i64: 3, 128, 128>}, {transform_indices = @transform_2, window_bounds = array<i64: 1, 1>}]} {
    %c1_i32 = arith.constant 1 : i32
    %0 = arith.cmpi slt, %arg0, %c1_i32 : i32
    %1 = arith.extui %0 : i1 to i32
    %c0_i32 = arith.constant 0 : i32
    %2 = arith.cmpi ne, %1, %c0_i32 : i32
    scf.if %2 {
      %c0 = arith.constant 0 : index
      %c0_2 = arith.constant 0 : index
      %6 = vector.load %arg1[%c0, %c0_2] : memref<128x256xbf16, #tpu.memory_space<vmem>>, vector<128x256xbf16>
      %cst = arith.constant dense<0.000000e+00> : vector<128x128xf32>
      %7 = tpu.matmul %6, %6, %cst {dimension_numbers = #tpu.dot_dimension_numbers<[1], [1], [0], [0], [0, 0, 1, 0], [], []>} : vector<128x256xbf16>, vector<128x256xbf16>, vector<128x128xf32> -> vector<128x128xf32>
      %c0_i32_3 = arith.constant 0 : i32
      %8 = arith.cmpi eq, %arg0, %c0_i32_3 : i32
      %9 = arith.extui %8 : i1 to i32
      %c0_i32_4 = arith.constant 0 : i32
      %10 = arith.cmpi ne, %9, %c0_i32_4 : i32
      scf.if %10 {
        %c0_9 = arith.constant 0 : index
        %c0_10 = arith.constant 0 : index
        %17 = vector.load %arg4[%c0_9, %c0_10] : memref<128x128xf32, #tpu.memory_space<vmem>>, vector<128x128xf32>
        tpu.vector_store %arg4[%c0_9, %c0_10], %7 {strides = array<i32>} : memref<128x128xf32, #tpu.memory_space<vmem>>, vector<128x128xf32>,
      } else {
      }
      %c0_i32_5 = arith.constant 0 : i32
      %11 = arith.cmpi sgt, %arg0, %c0_i32_5 : i32
      %12 = arith.extui %11 : i1 to i32
      %c0_i32_6 = arith.constant 0 : i32
      %13 = arith.cmpi ne, %12, %c0_i32_6 : i32
      scf.if %13 {
        %c0_9 = arith.constant 0 : index
        %c0_10 = arith.constant 0 : index
        %17 = vector.load %arg4[%c0_9, %c0_10] : memref<128x128xf32, #tpu.memory_space<vmem>>, vector<128x128xf32>
        %18 = arith.addf %17, %7 : vector<128x128xf32>
        %c0_11 = arith.constant 0 : index
        %c0_12 = arith.constant 0 : index
        %19 = vector.load %arg4[%c0_11, %c0_12] : memref<128x128xf32, #tpu.memory_space<vmem>>, vector<128x128xf32>
        tpu.vector_store %arg4[%c0_11, %c0_12], %18 {strides = array<i32>} : memref<128x128xf32, #tpu.memory_space<vmem>>, vector<128x128xf32>,
      } else {
      }
      %c0_i32_7 = arith.constant 0 : i32
      %14 = arith.cmpi eq, %arg0, %c0_i32_7 : i32
      %15 = arith.extui %14 : i1 to i32
      %c0_i32_8 = arith.constant 0 : i32
      %16 = arith.cmpi ne, %15, %c0_i32_8 : i32
      scf.if %16 {
        %c0_9 = arith.constant 0 : index
        %c0_10 = arith.constant 0 : index
        %17 = vector.load %arg4[%c0_9, %c0_10] : memref<128x128xf32, #tpu.memory_space<vmem>>, vector<128x128xf32>
        %cst_11 = arith.constant 3.05175781E-5 : f32
        %18 = vector.broadcast %cst_11 : f32 to vector<128x128xf32>
        %19 = arith.mulf %17, %18 : vector<128x128xf32>
        %c0_12 = arith.constant 0 : index
        %c0_13 = arith.constant 0 : index
        %20 = vector.load %arg4[%c0_12, %c0_13] : memref<128x128xf32, #tpu.memory_space<vmem>>, vector<128x128xf32>
        tpu.vector_store %arg4[%c0_12, %c0_13], %19 {strides = array<i32>} : memref<128x128xf32, #tpu.memory_space<vmem>>, vector<128x128xf32>,
      } else {
      }
    } else {
    }
    %c0_i32_0 = arith.constant 0 : i32
    %3 = arith.cmpi eq, %arg0, %c0_i32_0 : i32
    %4 = arith.extui %3 : i1 to i32
    %c0_i32_1 = arith.constant 0 : i32
    %5 = arith.cmpi ne, %4, %c0_i32_1 : i32
    scf.if %5 {
      %c0 = arith.constant 0 : index
      %c0_2 = arith.constant 0 : index
      %6 = vector.load %arg4[%c0, %c0_2] : memref<128x128xf32, #tpu.memory_space<vmem>>, vector<128x128xf32>
      %c0_3 = arith.constant 0 : index
      %c0_4 = arith.constant 0 : index
      %c0_5 = arith.constant 0 : index
      %7 = vector.load %arg2[%c0_3, %c0_4, %c0_5] : memref<3x128x128xbf16, #tpu.memory_space<vmem>>, vector<1x128x128xbf16>
      %8 = vector.shape_cast %7 : vector<1x128x128xbf16> to vector<128x128xbf16>
      %9 = arith.extf %8 : vector<128x128xbf16> to vector<128x128xf32>
      %10 = arith.subf %6, %9 : vector<128x128xf32>
      %11 = arith.mulf %10, %10 : vector<128x128xf32>
      %c0_i32_6 = arith.constant 0 : i32
      %12 = vector.broadcast %c0_i32_6 : i32 to vector<128x128xi32>
      %c1 = arith.constant 1 : index
      %c0_7 = arith.constant 0 : index
      %c0_8 = arith.constant 0 : index
      %13 = vector.load %arg2[%c1, %c0_7, %c0_8] : memref<3x128x128xbf16, #tpu.memory_space<vmem>>, vector<1x128x128xbf16>
      %14 = vector.shape_cast %13 : vector<1x128x128xbf16> to vector<128x128xbf16>
      %15 = arith.extf %14 : vector<128x128xbf16> to vector<128x128xf32>
      %16 = arith.subf %6, %15 : vector<128x128xf32>
      %17 = arith.mulf %16, %16 : vector<128x128xf32>
      %18 = arith.cmpf olt, %17, %11 : vector<128x128xf32>
      %19 = arith.select %18, %17, %11 : vector<128x128xi1>, vector<128x128xf32>
      %c1_i32_9 = arith.constant 1 : i32
      %20 = vector.broadcast %c1_i32_9 : i32 to vector<128x128xi32>
      %21 = arith.select %18, %20, %12 : vector<128x128xi1>, vector<128x128xi32>
      %c2 = arith.constant 2 : index
      %c0_10 = arith.constant 0 : index
      %c0_11 = arith.constant 0 : index
      %22 = vector.load %arg2[%c2, %c0_10, %c0_11] : memref<3x128x128xbf16, #tpu.memory_space<vmem>>, vector<1x128x128xbf16>
      %23 = vector.shape_cast %22 : vector<1x128x128xbf16> to vector<128x128xbf16>
      %24 = arith.extf %23 : vector<128x128xbf16> to vector<128x128xf32>
      %25 = arith.subf %6, %24 : vector<128x128xf32>
      %26 = arith.mulf %25, %25 : vector<128x128xf32>
      %27 = arith.cmpf olt, %26, %19 : vector<128x128xf32>
      %28 = arith.select %27, %26, %19 : vector<128x128xi1>, vector<128x128xf32>
      %c2_i32 = arith.constant 2 : i32
      %29 = vector.broadcast %c2_i32 : i32 to vector<128x128xi32>
      %30 = arith.select %27, %29, %21 : vector<128x128xi1>, vector<128x128xi32>
      %31 = vector.shape_cast %28 : vector<128x128xf32> to vector<1x128x128xf32>
      %cst = arith.constant dense<0.000000e+00> : vector<1xf32>
      %32 = vector.multi_reduction <add>, %31, %cst [1, 2] : vector<1x128x128xf32> to vector<1xf32>
      %33 = vector.shape_cast %32 : vector<1xf32> to vector<1x1x1xf32>
      %34 = vector.extract %33[0, 0, 0] : f32 from vector<1x1x1xf32>
      %c1_i32_12 = arith.constant 1 : i32
      %35 = tpu.dynamic_rotate %30 by %c1_i32_12 dim 0 : vector<128x128xi32>, i32 -> vector<128x128xi32>
      %36 = tpu.iota {dimensions = array<i32: 0>} : vector<128x128xi32>
      %37 = arith.cmpi ne, %30, %35 : vector<128x128xi32>
      %c1_i32_13 = arith.constant 1 : i32
      %38 = vector.broadcast %c1_i32_13 : i32 to vector<128x128xi32>
      %39 = arith.cmpi sge, %36, %38 : vector<128x128xi32>
      %40 = arith.andi %37, %39 : vector<128x128xi1>
      %41 = arith.extui %40 : vector<128x128xi1> to vector<128x128xi32>
      %42 = arith.sitofp %41 : vector<128x128xi32> to vector<128x128xf32>
      %43 = vector.shape_cast %42 : vector<128x128xf32> to vector<1x128x128xf32>
      %cst_14 = arith.constant dense<0.000000e+00> : vector<1xf32>
      %44 = vector.multi_reduction <add>, %43, %cst_14 [1, 2] : vector<1x128x128xf32> to vector<1xf32>
      %45 = vector.shape_cast %44 : vector<1xf32> to vector<1x1x1xf32>
      %46 = vector.extract %45[0, 0, 0] : f32 from vector<1x1x1xf32>
      %47 = arith.addf %34, %46 : f32
      %c1_i32_15 = arith.constant 1 : i32
      %48 = tpu.dynamic_rotate %30 by %c1_i32_15 dim 1 : vector<128x128xi32>, i32 -> vector<128x128xi32>
      %49 = tpu.iota {dimensions = array<i32: 1>} : vector<128x128xi32>
      %50 = arith.cmpi ne, %30, %48 : vector<128x128xi32>
      %c1_i32_16 = arith.constant 1 : i32
      %51 = vector.broadcast %c1_i32_16 : i32 to vector<128x128xi32>
      %52 = arith.cmpi sge, %49, %51 : vector<128x128xi32>
      %53 = arith.andi %50, %52 : vector<128x128xi1>
      %54 = arith.extui %53 : vector<128x128xi1> to vector<128x128xi32>
      %55 = arith.sitofp %54 : vector<128x128xi32> to vector<128x128xf32>
      %56 = vector.shape_cast %55 : vector<128x128xf32> to vector<1x128x128xf32>
      %cst_17 = arith.constant dense<0.000000e+00> : vector<1xf32>
      %57 = vector.multi_reduction <add>, %56, %cst_17 [1, 2] : vector<1x128x128xf32> to vector<1xf32>
      %58 = vector.shape_cast %57 : vector<1xf32> to vector<1x1x1xf32>
      %59 = vector.extract %58[0, 0, 0] : f32 from vector<1x1x1xf32>
      %60 = arith.addf %47, %59 : f32
      %c0_18 = arith.constant 0 : index
      %c0_19 = arith.constant 0 : index
      %61 = memref.load %arg3[%c0_18, %c0_19] : memref<1x1xf32, #tpu.memory_space<smem>>
      memref.store %60, %arg3[%c0_18, %c0_19] : memref<1x1xf32, #tpu.memory_space<smem>>
    } else {
    }
    return
  }
  func.func @transform_0(%arg0: i32) -> (i32, i32) {
    %c0_i32 = arith.constant 0 : i32
    %c0_i32_0 = arith.constant 0 : i32
    return %c0_i32, %arg0 : i32, i32
  }
  func.func @transform_1(%arg0: i32) -> (i32, i32, i32) {
    %c0_i32 = arith.constant 0 : i32
    %c0_i32_0 = arith.constant 0 : i32
    %c0_i32_1 = arith.constant 0 : i32
    %c0_i32_2 = arith.constant 0 : i32
    return %c0_i32, %c0_i32_0, %c0_i32_1 : i32, i32, i32
  }
  func.func @transform_2(%arg0: i32) -> (i32, i32) {
    %c0_i32 = arith.constant 0 : i32
    %c0_i32_0 = arith.constant 0 : i32
    %c0_i32_1 = arith.constant 0 : i32
    return %c0_i32, %c0_i32_0 : i32, i32
  }
}

</mosaic_0001>

<bundles_post_ra>
// kernel: tpu_custom_call.1
= control target key start
LH: loop header
LB: loop body
LE: loop exit
PB: predicated region body
PF: predicated region fallthrough
CT: control target
= control target key end

     0   :  { %7 = vsyncpa [#allocation4], 0  ;;  %s1955_s0 = inlined_call_operand.hbm [shape: bf16[128,256], index: 0, kind: input, shape index: {}]   ;;  %s1956_s1 = inlined_call_operand.hbm [shape: bf16[3,128,128], index: 1, kind: input, shape index: {}]   ;;  %s1957_s2 = inlined_call_operand.hbm [shape: f32[1,1], index: 2, kind: output, shape index: {}]  }
   0x1   :  { %8 = vsyncpa [#allocation7], 0 }
   0x2   :  { %9 = vsyncpa [#allocation5], 0  ;;  %s14_s11 = sshll.u32 %s1955_s0, 4  ;;  %s1324_s12 = smov [#allocation3]   ;;  %s15_s11 = int_to_ptr.hbm [resolvable:$true] %s14_s11 }
   0x3   :  { %s16_s13 = sshll.u32 %s1324_s12, 4  ;;  %s27_s16 = sshll.u32 %s1956_s1, 4  ;;  %s17_s13 = int_to_ptr.vmem [resolvable:$true] %s16_s13  ;;  %s28_s16 = int_to_ptr.hbm [resolvable:$true] %s27_s16 }
   0x4   :  { %s1325_s17 = smov 128   ;;  %s1326_s18 = smov 8  }
   0x5   :  { %22 = dma.hbm_to_vmem [thread:$0]  %s15_s11, 2048, %s17_s13, [#allocation4], %s1325_s17, %s1325_s17, %s1326_s18  }
   0x6   :  { %s1327_s19 = smov [#allocation6]   ;;  %s1328_s21 = smov 64  }
   0x7   :  { %s29_s20 = sshll.u32 %s1327_s19, 4  ;;  %s1329_s22 = smov 4   ;;  %s30_s20 = int_to_ptr.vmem [resolvable:$true] %s29_s20 }
   0x8   :  { %35 = dma.hbm_to_vmem [thread:$0]  %s28_s16, 3072, %s30_s20, [#allocation7], %s1328_s21, %s1328_s21, %s1329_s22  }
   0x9   :  { %1318 = dma.done.wait [#allocation4], 2048  }
   0xa   :  { %1319 = vsyncadd [#allocation4], 4294965248 }
   0xb   :  { %1320 = dma.done.wait [#allocation7], 3072  }
   0xc   :  { %1321 = vsyncadd [#allocation7], 4294964224  ;;  %v1055_v0 = vld [vmem:[#allocation3 + $0x70] sm:$0xf]  ;;  %v1108_v1 = vld [vmem:[#allocation3 + $0x74] sm:$0xf0] }
   0xd   :  { %v1107_v2 = vld [vmem:[#allocation3 + $0x74] sm:$0xf]  ;;  %v1355_v3 = vor.u32 %v1108_v1, %v1055_v0  ;;  %v1057_v4 = vld [vmem:[#allocation3 + $0x78] sm:$0xf0]  ;;  %v1047_v6 = vld [vmem:[#allocation3 + $0x60] sm:$0xf] }
   0xe   :  { %v1357_v5 = vor.u32 %v1107_v2, %v1057_v4  ;;  %v1106_v7 = vld [vmem:[#allocation3 + $0x64] sm:$0xf0]  ;;  %v1105_v8 = vld [vmem:[#allocation3 + $0x64] sm:$0xf]  ;;  %v1049_v9 = vld [vmem:[#allocation3 + $0x68] sm:$0xf0] }
   0xf   :  { %144 = vmatpush.bf16.xpose.msra.mxu0 %v1355_v3  ;;  %1226 = vmatpush.bf16.xpose.msra.mxu2 %v1355_v3  ;;  %v1363_v10 = vor.u32 %v1106_v7, %v1047_v6  ;;  %v1365_v11 = vor.u32 %v1105_v8, %v1049_v9  ;;  %v1039_v12 = vld [vmem:[#allocation3 + $0x50] sm:$0xf]  ;;  %v1104_v13 = vld [vmem:[#allocation3 + $0x54] sm:$0xf0]  ;;  %v1103_v14 = vld [vmem:[#allocation3 + $0x54] sm:$0xf] }
  0x10   :  { %193 = vmatpush.bf16.xpose.msra.mxu1 %v1357_v5  ;;  %1234 = vmatpush.bf16.xpose.msra.mxu3 %v1357_v5  ;;  %v1041_v15 = vld [vmem:[#allocation3 + $0x58] sm:$0xf0]  ;;  %v1040_v16 = vor.u32 %v1104_v13, %v1039_v12  ;;  %v1031_v18 = vld [vmem:[#allocation3 + $0x40] sm:$0xf]  ;;  %v1102_v19 = vld [vmem:[#allocation3 + $0x44] sm:$0xf0] }
  0x11   :  { %v1044_v17 = vor.u32 %v1103_v14, %v1041_v15  ;;  %v1101_v20 = vld [vmem:[#allocation3 + $0x44] sm:$0xf]  ;;  %v1033_v21 = vld [vmem:[#allocation3 + $0x48] sm:$0xf0]  ;;  %v1032_v22 = vor.u32 %v1102_v19, %v1031_v18  ;;  %v1023_v24 = vld [vmem:[#allocation3 + $0x30] sm:$0xf] }
  0x12   :  { %v1036_v23 = vor.u32 %v1101_v20, %v1033_v21  ;;  %v1100_v25 = vld [vmem:[#allocation3 + $0x34] sm:$0xf0]  ;;  %v1099_v26 = vld [vmem:[#allocation3 + $0x34] sm:$0xf]  ;;  %v1025_v27 = vld [vmem:[#allocation3 + $0x38] sm:$0xf0] }
  0x13   :  { %v1024_v28 = vor.u32 %v1100_v25, %v1023_v24  ;;  %v1028_v29 = vor.u32 %v1099_v26, %v1025_v27  ;;  %v1015_v30 = vld [vmem:[#allocation3 + $0x20] sm:$0xf]  ;;  %v1098_v31 = vld [vmem:[#allocation3 + $0x24] sm:$0xf0]  ;;  %v1097_v32 = vld [vmem:[#allocation3 + $0x24] sm:$0xf] }
  0x14   :  { %v1017_v33 = vld [vmem:[#allocation3 + $0x28] sm:$0xf0]  ;;  %v1016_v34 = vor.u32 %v1098_v31, %v1015_v30  ;;  %v1007_v36 = vld [vmem:[#allocation3 + $0x10] sm:$0xf]  ;;  %v1096_v37 = vld [vmem:[#allocation3 + $0x14] sm:$0xf0] }
  0x15   :  { %v1020_v35 = vor.u32 %v1097_v32, %v1017_v33  ;;  %v1095_v38 = vld [vmem:[#allocation3 + $0x14] sm:$0xf]  ;;  %v1009_v39 = vld [vmem:[#allocation3 + $0x18] sm:$0xf0]  ;;  %v1008_v40 = vor.u32 %v1096_v37, %v1007_v36  ;;  %v999_v42 = vld [vmem:[#allocation3] sm:$0xf] }
  0x16   :  { %v1012_v41 = vor.u32 %v1095_v38, %v1009_v39  ;;  %v1094_v43 = vld [vmem:[#allocation3 + $0x4] sm:$0xf0]  ;;  %v1093_v44 = vld [vmem:[#allocation3 + $0x4] sm:$0xf]  ;;  %v1001_v45 = vld [vmem:[#allocation3 + $0x8] sm:$0xf0] }
  0x17   :  { %145 = vmatpush.bf16.xpose.msra.mxu0 %v1363_v10  ;;  %1227 = vmatpush.bf16.xpose.msra.mxu2 %v1363_v10  ;;  %v1000_v46 = vor.u32 %v1094_v43, %v999_v42  ;;  %v1004_v47 = vor.u32 %v1093_v44, %v1001_v45  ;;  %v1110_v48 = vld [vmem:[#allocation6] sm:$0xff]   ;;  %v1330_v9 = vmov 0   ;;  %v1205_v18 = vld [vmem:[#allocation6 + $0x8] sm:$0xff]   ;;  %s1331_s0 = smov 1   ;;  %s985_s26 = sshll.u32 %s1957_s2, 4  ;;  %s986_s26 = int_to_ptr.hbm [resolvable:$true] %s985_s26 }
  0x18   :  { %194 = vmatpush.bf16.xpose.msra.mxu1 %v1365_v11  ;;  %1235 = vmatpush.bf16.xpose.msra.mxu3 %v1365_v11  ;;  %v1142_v49 = vld [vmem:[#allocation6 + $0x40] sm:$0xff]   ;;  %v1111_v54 = vunpack.c.l.bf16 %v1110_v48  ;;  %v1112_v4 = vunpack.c.h.bf16 %v1110_v48  ;;  %v1212_v21 = vld [vmem:[#allocation6 + $0x48] sm:$0xff]   ;;  %v1115_v27 = vunpack.c.l.bf16 %v1205_v18  ;;  %s1333_s30 = smov [#allocation8]  }
  0x19   :  { %v1174_v51 = vld [vmem:[#allocation6 + $0x80] sm:$0xff]   ;;  %v1143_v55 = vunpack.c.l.bf16 %v1142_v49  ;;  %v1144_v6 = vunpack.c.h.bf16 %v1142_v49  ;;  %v1219_v25 = vld [vmem:[#allocation6 + $0x88] sm:$0xff]  }
  0x1a   :  { %v1175_v56 = vunpack.c.l.bf16 %v1174_v51  ;;  %v1179_v30 = vunpack.c.l.bf16 %v1219_v25  ;;  %v1391_v43 = vld [vmem:[#allocation6 + $0x20] sm:$0xff]  }
  0x1b   :  { %v1395_v48 = vld [vmem:[#allocation6 + $0x60] sm:$0xff]  }
  0x1f   :  { %146 = vmatpush.bf16.xpose.msra.mxu0 %v1040_v16  ;;  %1228 = vmatpush.bf16.xpose.msra.mxu2 %v1040_v16 }
  0x20   :  { %195 = vmatpush.bf16.xpose.msra.mxu1 %v1044_v17  ;;  %1236 = vmatpush.bf16.xpose.msra.mxu3 %v1044_v17 }
  0x27   :  { %147 = vmatpush.bf16.xpose.msra.mxu0 %v1032_v22  ;;  %1229 = vmatpush.bf16.xpose.msra.mxu2 %v1032_v22 }
  0x28   :  { %196 = vmatpush.bf16.xpose.msra.mxu1 %v1036_v23  ;;  %1237 = vmatpush.bf16.xpose.msra.mxu3 %v1036_v23 }
  0x2f   :  { %148 = vmatpush.bf16.xpose.msra.mxu0 %v1024_v28  ;;  %1230 = vmatpush.bf16.xpose.msra.mxu2 %v1024_v28 }
  0x30   :  { %197 = vmatpush.bf16.xpose.msra.mxu1 %v1028_v29  ;;  %1238 = vmatpush.bf16.xpose.msra.mxu3 %v1028_v29 }
  0x37   :  { %149 = vmatpush.bf16.xpose.msra.mxu0 %v1016_v34  ;;  %1231 = vmatpush.bf16.xpose.msra.mxu2 %v1016_v34 }
  0x38   :  { %198 = vmatpush.bf16.xpose.msra.mxu1 %v1020_v35  ;;  %1239 = vmatpush.bf16.xpose.msra.mxu3 %v1020_v35 }
  0x3f   :  { %150 = vmatpush.bf16.xpose.msra.mxu0 %v1008_v40  ;;  %1232 = vmatpush.bf16.xpose.msra.mxu2 %v1008_v40 }
  0x40   :  { %199 = vmatpush.bf16.xpose.msra.mxu1 %v1012_v41  ;;  %1240 = vmatpush.bf16.xpose.msra.mxu3 %v1012_v41 }
  0x47   :  { %151 = vmatpush.bf16.xpose.msra.mxu0 %v1000_v46  ;;  %1233 = vmatpush.bf16.xpose.msra.mxu2 %v1000_v46 }
  0x48   :  { %200 = vmatpush.bf16.xpose.msra.mxu1 %v1004_v47  ;;  %1241 = vmatpush.bf16.xpose.msra.mxu3 %v1004_v47 }
  0x4e   :  { %152 = vmatmul.bf16.vlgmr.msra.gmra.mxu0 %v1000_v46  ;;  %172 = vmatmul.bf16.vlgmr.msra.gmra.mxu2 %v1032_v22 }
  0x4f   :  { %201 = vmatmul.bf16.vlgmr.msra.gmra.mxu1 %v1004_v47  ;;  %221 = vmatmul.bf16.vlgmr.msra.gmra.mxu3 %v1036_v23 }
  0x5e   :  { %157 = vmatmul.bf16.gmra.mxu0 %v1008_v40  ;;  %177 = vmatmul.bf16.gmra.mxu2 %v1040_v16 }
  0x5f   :  { %206 = vmatmul.bf16.gmra.mxu1 %v1012_v41  ;;  %226 = vmatmul.bf16.gmra.mxu3 %v1044_v17 }
  0x6e   :  { %162 = vmatmul.bf16.gmra.mxu0 %v1016_v34  ;;  %182 = vmatmul.bf16.gmra.mxu2 %v1363_v10 }
  0x6f   :  { %211 = vmatmul.bf16.gmra.mxu1 %v1020_v35  ;;  %231 = vmatmul.bf16.gmra.mxu3 %v1365_v11  ;;  %v1176_v11 = vunpack.c.h.bf16 %v1174_v51  ;;  %v1116_v51 = vunpack.c.h.bf16 %v1205_v18  ;;  %v1422_v18 = vld [vmem:[#allocation6 + $0x50] sm:$0xff]  }
  0x7e   :  { %167 = vmatmul.bf16.gmra.mxu0 %v1024_v28  ;;  %187 = vmatmul.bf16.gmra.mxu2 %v1355_v3  ;;  %v1147_v28 = vunpack.c.l.bf16 %v1212_v21 }
  0x7f   :  { %216 = vmatmul.bf16.gmra.mxu1 %v1028_v29  ;;  %236 = vmatmul.bf16.gmra.mxu3 %v1357_v5 }
  0xcb   :  { %v153_v50 = vpop.f32.mrf.mxu0 }
  0xcc   :  { %v202_v52 = vpop.f32.mrf.mxu1 }
  0xcd   :  { %v203_v53 = vadd.f32 %v202_v52, %v153_v50  ;;  %v1397_v50 = vld [vmem:[#allocation6 + $0xa0] sm:$0xff]   ;;  %v1148_v52 = vunpack.c.h.bf16 %v1212_v21 }
  0xcf   :  { %v333_v57 = vmul.f32 3.0517578e-05, %v203_v53  ;;  %v1127_v53 = vunpack.c.l.bf16 %v1391_v43 }
  0xd1   :  { %v417_v58 = vsub.f32 %v333_v57, %v1111_v54  ;;  %v482_v59 = vsub.f32 %v333_v57, %v1143_v55  ;;  %v173_v60 = vpop.f32.mrf.mxu2  ;;  %v595_v61 = vsub.f32 %v333_v57, %v1175_v56  ;;  %v1180_v55 = vunpack.c.h.bf16 %v1219_v25 }
  0xd2   :  { %v222_v62 = vpop.f32.mrf.mxu3  ;;  %v1159_v56 = vunpack.c.l.bf16 %v1395_v48 }
  0xd3   :  { %v433_v63 = vmul.f32 %v417_v58, %v417_v58  ;;  %v498_v0 = vmul.f32 %v482_v59, %v482_v59  ;;  %v155_v1 = vpop.f32.mrf.mxu0  ;;  %v611_v5 = vmul.f32 %v595_v61, %v595_v61  ;;  %v223_v47 = vadd.f32 %v222_v62, %v173_v60 }
  0xd4   :  { %v204_v2 = vpop.f32.mrf.mxu1  ;;  %v1191_v60 = vunpack.c.l.bf16 %v1397_v50  ;;  %v1128_v62 = vunpack.c.h.bf16 %v1391_v43 }
  0xd5   :  { %v205_v3 = vadd.f32 %v204_v2, %v155_v1  ;;  %vm514_vm0 = vcmp.lt.f32.partialorder %v498_v0, %v433_v63  ;;  %v341_v61 = vmul.f32 3.0517578e-05, %v223_v47  ;;  %v1160_v1 = vunpack.c.h.bf16 %v1395_v48  ;;  %v1409_v2 = vld [vmem:[#allocation6 + $0x68] sm:$0xff]  }
  0xd6   :  { %v530_v7 = vsel %vm514_vm0, %v498_v0, %v433_v63  ;;  %v546_v10 = vsel %vm514_vm0, 1, %v1330_v9  ;;  %v1404_v63 = vld [vmem:[#allocation6 + $0x28] sm:$0xff]  }
  0xd7   :  { %v334_v8 = vmul.f32 3.0517578e-05, %v205_v3  ;;  %vm627_vm1 = vcmp.lt.f32.partialorder %v611_v5, %v530_v7  ;;  %v1411_v3 = vld [vmem:[#allocation6 + $0xa8] sm:$0xff]   ;;  %v425_v25 = vsub.f32 %v341_v61, %v1127_v53 }
  0xd8   :  { %v1378_v15 = vsel %vm627_vm1, 2, %v546_v10  ;;  %v643_v16 = vsel %vm627_vm1, %v611_v5, %v530_v7  ;;  %v715_v10 = vlaneseq }
  0xd9   :  { %v418_v12 = vsub.f32 %v334_v8, %v1112_v4  ;;  %v1376_v13 = vpop.f32.mrf.mxu2  ;;  %v483_v14 = vsub.f32 %v334_v8, %v1144_v6  ;;  %854 = vrot.lane.b32.xlu0 %v1378_v15, %s1331_s0  ;;  %v596_v23 = vsub.f32 %v334_v8, %v1176_v11  ;;  %v1192_v8 = vunpack.c.h.bf16 %v1397_v50 }
  0xda   :  { %v1380_v17 = vpop.f32.mrf.mxu3 }
  0xdb   :  { %v434_v19 = vmul.f32 %v418_v12, %v418_v12  ;;  %v158_v20 = vpop.f32.mrf.mxu0  ;;  %v499_v22 = vmul.f32 %v483_v14, %v483_v14  ;;  %v612_v31 = vmul.f32 %v596_v23, %v596_v23 }
  0xdc   :  { %v207_v24 = vpop.f32.mrf.mxu1 }
  0xdd   :  { %v208_v26 = vadd.f32 %v207_v24, %v158_v20  ;;  %vm515_vm2 = vcmp.lt.f32.partialorder %v499_v22, %v434_v19  ;;  %v1425_v24 = vld [vmem:[#allocation6 + $0x90] sm:$0xff]  }
  0xde   :  { %v531_v32 = vsel %vm515_vm2, %v499_v22, %v434_v19  ;;  %v547_v33 = vsel %vm515_vm2, 1, %v1330_v9  ;;  %v1131_v19 = vunpack.c.l.bf16 %v1404_v63 }
  0xdf   :  { %v335_v29 = vmul.f32 3.0517578e-05, %v208_v26  ;;  %vm628_vm3 = vcmp.lt.f32.partialorder %v612_v31, %v531_v32  ;;  %v1163_v26 = vunpack.c.l.bf16 %v1409_v2 }
  0xe0   :  { %v644_v40 = vsel %vm628_vm3, %v612_v31, %v531_v32  ;;  %v1389_v41 = vsel %vm628_vm3, 2, %v547_v33  ;;  %v1151_v31 = vunpack.c.l.bf16 %v1422_v18  ;;  %v225_v32 = vadd.f32 %v1380_v17, %v1376_v13 }
  0xe1   :  { %v419_v34 = vsub.f32 %v335_v29, %v1115_v27  ;;  %v1385_v35 = vpop.f32.mrf.mxu2  ;;  %v484_v36 = vsub.f32 %v335_v29, %v1147_v28  ;;  %v597_v39 = vsub.f32 %v335_v29, %v1179_v30  ;;  %856 = vrot.lane.b32.xlu0 %v1389_v41, %s1331_s0  ;;  %v675_v45 = vadd.f32 %v644_v40, %v643_v16  ;;  %v1420_v16 = vld [vmem:[#allocation6 + $0x10] sm:$0xff]  }
  0xe2   :  { %v1387_v37 = vpop.f32.mrf.mxu3  ;;  %v1195_v27 = vunpack.c.l.bf16 %v1411_v3  ;;  %v490_v29 = vsub.f32 %v341_v61, %v1159_v56  ;;  %v1119_v30 = vunpack.c.l.bf16 %v1420_v16 }
  0xe3   :  { %v435_v38 = vmul.f32 %v419_v34, %v419_v34  ;;  %v160_v42 = vpop.f32.mrf.mxu0  ;;  %v500_v44 = vmul.f32 %v484_v36, %v484_v36  ;;  %v613_v54 = vmul.f32 %v597_v39, %v597_v39  ;;  %v1132_v34 = vunpack.c.h.bf16 %v1404_v63 }
  0xe4   :  { %v209_v46 = vpop.f32.mrf.mxu1  ;;  %v1183_v36 = vunpack.c.l.bf16 %v1425_v24  ;;  %v506_v13 = vmul.f32 %v490_v29, %v490_v29 }
  0xe5   :  { %v210_v49 = vadd.f32 %v209_v46, %v160_v42  ;;  %vm516_vm4 = vcmp.lt.f32.partialorder %v500_v44, %v435_v38  ;;  %v1196_v46 = vunpack.c.h.bf16 %v1411_v3 }
  0xe6   :  { %v532_v58 = vsel %vm516_vm4, %v500_v44, %v435_v38  ;;  %v548_v59 = vsel %vm516_vm4, 1, %v1330_v9  ;;  %v1164_v38 = vunpack.c.h.bf16 %v1409_v2  ;;  %v441_v44 = vmul.f32 %v425_v25, %v425_v25 }
  0xe7   :  { %v336_v57 = vmul.f32 3.0517578e-05, %v210_v49  ;;  %vm629_vm5 = vcmp.lt.f32.partialorder %v613_v54, %v532_v58  ;;  %v1440_v49 = vld [vmem:[#allocation6 + $0x30] sm:$0xff]  }
  0xe8   :  { %v1413_v6 = vsel %vm629_vm5, 2, %v548_v59  ;;  %v645_v12 = vsel %vm629_vm5, %v613_v54, %v532_v58  ;;  %v1444_v54 = vld [vmem:[#allocation6 + $0x70] sm:$0xff]   ;;  %vm522_vm9 = vcmp.lt.f32.partialorder %v506_v13, %v441_v44 }
  0xe9   :  { %v1406_v0 = vpop.f32.mrf.mxu2  ;;  %v420_v4 = vsub.f32 %v336_v57, %v1116_v51  ;;  %v485_v5 = vsub.f32 %v336_v57, %v1148_v52  ;;  %v598_v11 = vsub.f32 %v336_v57, %v1180_v55  ;;  %858 = vrot.lane.b32.xlu1 %v1413_v6, %s1331_s0  ;;  %v676_v22 = vadd.f32 %v675_v45, %v645_v12 }
  0xea   :  { %v1415_v7 = vpop.f32.mrf.mxu3  ;;  %v603_v45 = vsub.f32 %v341_v61, %v1191_v60  ;;  %v342_v55 = vmul.f32 3.0517578e-05, %v225_v32  ;;  %v228_v61 = vadd.f32 %v1387_v37, %v1385_v35  ;;  %v1184_v35 = vunpack.c.h.bf16 %v1425_v24 }
  0xeb   :  { %v163_v14 = vpop.f32.mrf.mxu0  ;;  %v436_v20 = vmul.f32 %v420_v4, %v420_v4  ;;  %v501_v21 = vmul.f32 %v485_v5, %v485_v5  ;;  %v614_v33 = vmul.f32 %v598_v11, %v598_v11  ;;  %v1135_v5 = vunpack.c.l.bf16 %v1440_v49 }
  0xec   :  { %v212_v23 = vpop.f32.mrf.mxu1  ;;  %v1455_v12 = vmul.f32 %v603_v45, %v603_v45  ;;  %v426_v37 = vsub.f32 %v342_v55, %v1128_v62  ;;  %v491_v25 = vsub.f32 %v342_v55, %v1160_v1  ;;  %v230_v24 = vadd.f32 %v1415_v7, %v1406_v0  ;;  %v1504_v45 = vld [vmem:[#allocation6 + $0x58] sm:$0xff]  }
  0xed   :  { %v213_v28 = vadd.f32 %v212_v23, %v163_v14  ;;  %vm517_vm6 = vcmp.lt.f32.partialorder %v501_v21, %v436_v20  ;;  %v1167_v14 = vunpack.c.l.bf16 %v1444_v54  ;;  %v1152_v23 = vunpack.c.h.bf16 %v1422_v18 }
  0xee   :  { %v533_v40 = vsel %vm517_vm6, %v501_v21, %v436_v20  ;;  %v549_v42 = vsel %vm517_vm6, 1, %v1330_v9  ;;  %v1120_v21 = vunpack.c.h.bf16 %v1420_v16  ;;  %v343_v16 = vmul.f32 3.0517578e-05, %v228_v61 }
  0xef   :  { %v337_v39 = vmul.f32 3.0517578e-05, %v213_v28  ;;  %vm630_vm7 = vcmp.lt.f32.partialorder %v614_v33, %v533_v40  ;;  %v604_v28 = vsub.f32 %v342_v55, %v1192_v8  ;;  %v1482_v50 = vsel %vm522_vm9, %v506_v13, %v441_v44  ;;  %v1510_v55 = vld [vmem:[#allocation6 + $0x98] sm:$0xff]  }
  0xf0   :  { %v646_v52 = vsel %vm630_vm7, %v614_v33, %v533_v40  ;;  %v1446_v57 = vsel %vm630_vm7, 2, %v549_v42  ;;  %v1493_v0 = vsel %vm522_vm9, 1, %v1330_v9  ;;  %v1495_v7 = vmul.f32 %v426_v37, %v426_v37  ;;  %v1502_v42 = vld [vmem:[#allocation6 + $0x18] sm:$0xff]  }
  0xf1   :  { %v1438_v47 = vpop.f32.mrf.mxu2  ;;  %v421_v17 = vsub.f32 %v337_v39, %v1119_v30  ;;  %v486_v51 = vsub.f32 %v337_v39, %v1151_v31  ;;  %v599_v56 = vsub.f32 %v337_v39, %v1183_v36  ;;  %v1448_v58 = vadd.f32 %v676_v22, %v646_v52  ;;  %860 = vrot.lane.b32.xlu1 %v1446_v57, %s1331_s0  ;;  %v1459_v22 = vld [vmem:[#allocation6 + $0xb0] sm:$0xff]  }
  0xf2   :  { %v1442_v53 = vpop.f32.mrf.mxu3  ;;  %v1199_v43 = vunpack.c.l.bf16 %v1459_v22  ;;  %v1497_v33 = vmul.f32 %v491_v25, %v491_v25  ;;  %v1136_v39 = vunpack.c.h.bf16 %v1440_v49  ;;  %v427_v44 = vsub.f32 %v343_v16, %v1131_v19 }
  0xf3   :  { %v165_v59 = vpop.f32.mrf.mxu0  ;;  %v437_v60 = vmul.f32 %v421_v17, %v421_v17  ;;  %v502_v4 = vmul.f32 %v486_v51, %v486_v51  ;;  %v1469_v29 = vmul.f32 %v599_v56, %v599_v56  ;;  %v1506_v17 = vmul.f32 %v604_v28, %v604_v28 }
  0xf4   :  { %v214_v11 = vpop.f32.mrf.mxu1  ;;  %vm635_vm11 = vcmp.lt.f32.partialorder %v1455_v12, %v1482_v50  ;;  %v492_v56 = vsub.f32 %v343_v16, %v1163_v26  ;;  %v1168_v61 = vunpack.c.h.bf16 %v1444_v54  ;;  %v1155_v19 = vunpack.c.l.bf16 %v1504_v45 }
  0xf5   :  { %v215_v20 = vadd.f32 %v214_v11, %v165_v59  ;;  %vm518_vm8 = vcmp.lt.f32.partialorder %v502_v4, %v437_v60  ;;  %v344_v59 = vmul.f32 3.0517578e-05, %v230_v24  ;;  %v1123_v11 = vunpack.c.l.bf16 %v1502_v42  ;;  %v1546_v24 = vld [vmem:[#allocation6 + $0xb8] sm:$0xff]  }
  0xf6   :  { %v1471_v31 = vsel %vm518_vm8, %v502_v4, %v437_v60  ;;  %v550_v18 = vsel %vm518_vm8, 1, %v1330_v9  ;;  %v1200_v4 = vunpack.c.h.bf16 %v1459_v22  ;;  %v1187_v26 = vunpack.c.l.bf16 %v1510_v55 }
  0xf7   :  { %v338_v30 = vmul.f32 3.0517578e-05, %v215_v20  ;;  %vm631_vm10 = vcmp.lt.f32.partialorder %v1469_v29, %v1471_v31  ;;  %v1522_v20 = vsub.f32 %v343_v16, %v1195_v27  ;;  %v1531_v37 = vmul.f32 %v427_v44, %v427_v44  ;;  %v1544_v16 = vld [vmem:[#allocation6 + $0x78] sm:$0xff]  }
  0xf8   :  { %v1487_v8 = vsel %vm631_vm10, 2, %v550_v18  ;;  %v1536_v18 = vmul.f32 %v492_v56, %v492_v56  ;;  %v428_v27 = vsub.f32 %v344_v59, %v1132_v34  ;;  %v1171_v3 = vunpack.c.l.bf16 %v1544_v16 }
  0xf9   :  { %v1479_v48 = vpop.f32.mrf.mxu2  ;;  %v422_v62 = vsub.f32 %v338_v30, %v1120_v21  ;;  %v487_v1 = vsub.f32 %v338_v30, %v1152_v23  ;;  %v600_v36 = vsub.f32 %v338_v30, %v1184_v35  ;;  %862 = vrot.lane.b32.xlu2 %v1487_v8, %s1331_s0  ;;  %v233_v21 = vadd.f32 %v1442_v53, %v1438_v47  ;;  %v1529_v35 = vld [vmem:[#allocation6 + $0x38] sm:$0xff]  }
  0xfa   :  { %v1489_v32 = vpop.f32.mrf.mxu3  ;;  %v493_v47 = vsub.f32 %v344_v59, %v1164_v38  ;;  %v1139_v63 = vunpack.c.l.bf16 %v1529_v35  ;;  %vm523_vm1 = vcmp.lt.f32.partialorder %v1497_v33, %v1495_v7  ;;  %vm524_vm7 = vcmp.lt.f32.partialorder %v1536_v18, %v1531_v37 }
  0xfb   :  { %v168_v40 = vpop.f32.mrf.mxu0  ;;  %v438_v13 = vmul.f32 %v422_v62, %v422_v62  ;;  %v503_v51 = vmul.f32 %v487_v1, %v487_v1  ;;  %v1526_v23 = vmul.f32 %v600_v36, %v600_v36  ;;  %v606_v62 = vsub.f32 %v344_v59, %v1196_v46 }
  0xfc   :  { %v217_v52 = vpop.f32.mrf.mxu1  ;;  %v345_v34 = vmul.f32 3.0517578e-05, %v233_v21  ;;  %v1203_v46 = vunpack.c.l.bf16 %v1546_v24  ;;  %v444_v59 = vmul.f32 %v428_v27, %v428_v27  ;;  %v1573_v27 = vsel %vm635_vm11, 2, %v1493_v0 }
  0xfd   :  { %v218_v60 = vadd.f32 %v217_v52, %v168_v40  ;;  %vm519_vm12 = vcmp.lt.f32.partialorder %v503_v51, %v438_v13  ;;  %v1561_v21 = vmul.f32 %v606_v62, %v606_v62 }
  0xfe   :  { %v1533_v28 = vsel %vm519_vm12, %v503_v51, %v438_v13  ;;  %v551_v30 = vsel %vm519_vm12, 1, %v1330_v9 }
  0xff   :  { %v339_v25 = vmul.f32 3.0517578e-05, %v218_v60  ;;  %vm632_vm13 = vcmp.lt.f32.partialorder %v1526_v23, %v1533_v28  ;;  %v509_v60 = vmul.f32 %v493_v47, %v493_v47 }
 0x100   :  { %v1554_v2 = vsel %vm632_vm13, 2, %v551_v30  ;;  %v429_v30 = vsub.f32 %v345_v34, %v1135_v5  ;;  %v235_v5 = vadd.f32 %v1489_v32, %v1479_v48 }
 0x101   :  { %v188_v53 = vpop.f32.mrf.mxu2  ;;  %v423_v1 = vsub.f32 %v339_v25, %v1123_v11  ;;  %v488_v36 = vsub.f32 %v339_v25, %v1155_v19  ;;  %v601_v44 = vsub.f32 %v339_v25, %v1187_v26  ;;  %864 = vrot.lane.b32.xlu2 %v1554_v2, %s1331_s0  ;;  %v1124_v19 = vunpack.c.h.bf16 %v1502_v42 }
 0x102   :  { %v237_v40 = vpop.f32.mrf.mxu3  ;;  %v1156_v25 = vunpack.c.h.bf16 %v1504_v45  ;;  %v494_v42 = vsub.f32 %v345_v34, %v1167_v14  ;;  %vm525_vm0 = vcmp.lt.f32.partialorder %v509_v60, %v444_v59 }
 0x103   :  { %v238_v38 = vadd.f32 %v237_v40, %v188_v53  ;;  %v170_v13 = vpop.f32.mrf.mxu0  ;;  %v439_v51 = vmul.f32 %v423_v1, %v423_v1  ;;  %v504_v52 = vmul.f32 %v488_v36, %v488_v36  ;;  %v1566_v53 = vmul.f32 %v601_v44, %v601_v44 }
 0x104   :  { %v219_v56 = vpop.f32.mrf.mxu1  ;;  %v1188_v1 = vunpack.c.h.bf16 %v1510_v55 }
 0x105   :  { %v220_v11 = vadd.f32 %v219_v56, %v170_v13  ;;  %v347_v26 = vmul.f32 3.0517578e-05, %v238_v38  ;;  %vm520_vm14 = vcmp.lt.f32.partialorder %v504_v52, %v439_v51  ;;  %v607_v38 = vsub.f32 %v345_v34, %v1199_v43 }
 0x106   :  { %v1577_v62 = vsel %vm520_vm14, %v504_v52, %v439_v51  ;;  %v552_v45 = vsel %vm520_vm14, 1, %v1330_v9  ;;  %v445_v43 = vmul.f32 %v429_v30, %v429_v30  ;;  %v346_v34 = vmul.f32 3.0517578e-05, %v235_v5 }
 0x107   :  { %v340_v47 = vmul.f32 3.0517578e-05, %v220_v11  ;;  %vm633_vm15 = vcmp.lt.f32.partialorder %v1566_v53, %v1577_v62  ;;  %v431_v0 = vsub.f32 %v347_v26, %v1139_v63  ;;  %v496_v36 = vsub.f32 %v347_v26, %v1171_v3 }
 0x108   :  { %v1591_v48 = vsel %vm633_vm15, 2, %v552_v45  ;;  %v1140_v63 = vunpack.c.h.bf16 %v1529_v35  ;;  %v1599_v3 = vsel %vm525_vm0, %v509_v60, %v444_v59  ;;  %v1172_v56 = vunpack.c.h.bf16 %v1544_v16 }
 0x109   :  { %v190_v55 = vpop.f32.mrf.mxu2  ;;  %v424_v40 = vsub.f32 %v340_v47, %v1124_v19  ;;  %v489_v14 = vsub.f32 %v340_v47, %v1156_v25  ;;  %v602_v13 = vsub.f32 %v340_v47, %v1188_v1  ;;  %870 = vrot.lane.b32.xlu2 %v1573_v27, %s1331_s0  ;;  %866 = vrot.lane.b32.xlu0 %v1591_v48, %s1331_s0  ;;  %v557_v1 = vsel %vm525_vm0, 1, %v1330_v9 }
 0x10a   :  { %v239_v44 = vpop.f32.mrf.mxu3  ;;  %v1607_v11 = vsel %vm523_vm1, %v1497_v33, %v1495_v7  ;;  %v447_v19 = vmul.f32 %v431_v0, %v431_v0  ;;  %v512_v25 = vmul.f32 %v496_v36, %v496_v36  ;;  %v609_v35 = vsub.f32 %v347_v26, %v1203_v46 }
 0x10b   :  { %v240_v32 = vadd.f32 %v239_v44, %v190_v55  ;;  %v440_v51 = vmul.f32 %v424_v40, %v424_v40  ;;  %v505_v52 = vmul.f32 %v489_v14, %v489_v14  ;;  %v1611_v47 = vmul.f32 %v602_v13, %v602_v13 }
 0x10c   :  { %vm638_vm3 = vcmp.lt.f32.partialorder %v1561_v21, %v1599_v3  ;;  %v555_v5 = vsel %vm523_vm1, 1, %v1330_v9  ;;  %vm636_vm4 = vcmp.lt.f32.partialorder %v1506_v17, %v1607_v11  ;;  %v510_v59 = vmul.f32 %v494_v42, %v494_v42 }
 0x10d   :  { %vm521_vm2 = vcmp.lt.f32.partialorder %v505_v52, %v440_v51  ;;  %v348_v30 = vmul.f32 3.0517578e-05, %v240_v32  ;;  %v430_v46 = vsub.f32 %v346_v34, %v1136_v39  ;;  %v495_v60 = vsub.f32 %v346_v34, %v1168_v61 }
 0x10e   :  { %v1615_v16 = vsel %vm521_vm2, %v505_v52, %v440_v51  ;;  %v553_v45 = vsel %vm521_vm2, 1, %v1330_v9  ;;  %v1632_v26 = vmul.f32 %v1522_v20, %v1522_v20  ;;  %v1204_v7 = vunpack.c.h.bf16 %v1546_v24 }
 0x10f   :  { %vm634_vm5 = vcmp.lt.f32.partialorder %v1611_v47, %v1615_v16  ;;  %vm528_vm6 = vcmp.lt.f32.partialorder %v512_v25, %v447_v19  ;;  %v432_v49 = vsub.f32 %v348_v30, %v1140_v63  ;;  %v497_v39 = vsub.f32 %v348_v30, %v1172_v56 }
 0x110   :  { %v1638_v33 = vsel %vm634_vm5, 2, %v553_v45  ;;  %v1643_v54 = vsel %vm638_vm3, 2, %v557_v1  ;;  %v1650_v61 = vsel %vm636_vm4, 2, %v555_v5  ;;  %v1652_v20 = vmul.f32 %v607_v38, %v607_v38 }
 0x111   :  { %868 = vrot.lane.b32.xlu1 %v1638_v33, %s1331_s0  ;;  %v1654_v24 = vmul.f32 %v609_v35, %v609_v35  ;;  %876 = vrot.lane.b32.xlu2 %v1643_v54, %s1331_s0  ;;  %v446_v42 = vmul.f32 %v430_v46, %v430_v46  ;;  %v511_v55 = vmul.f32 %v495_v60, %v495_v60  ;;  %v1666_v36 = vshrl.u32 %v715_v10, 7 }
 0x112   :  { %872 = vrot.lane.b32.xlu0 %v1650_v61, %s1331_s0  ;;  %v1663_v0 = vsel %vm528_vm6, %v512_v25, %v447_v19  ;;  %vm526_vm8 = vcmp.lt.f32.partialorder %v510_v59, %v445_v43  ;;  %v608_v40 = vsub.f32 %v346_v34, %v1200_v4  ;;  %v610_v14 = vsub.f32 %v348_v30, %v1204_v7 }
 0x113   :  { %v1672_v44 = vsel %vm524_vm7, %v1536_v18, %v1531_v37  ;;  %v448_v38 = vmul.f32 %v432_v49, %v432_v49  ;;  %v513_v13 = vmul.f32 %v497_v39, %v497_v39  ;;  %v560_v32 = vsel %vm528_vm6, 1, %v1330_v9 }
 0x114   :  { %v556_v51 = vsel %vm524_vm7, 1, %v1330_v9  ;;  %vm641_vm9 = vcmp.lt.f32.partialorder %v1654_v24, %v1663_v0  ;;  %vm637_vm12 = vcmp.lt.f32.partialorder %v1632_v26, %v1672_v44  ;;  %v1681_v22 = vsel %vm526_vm8, %v510_v59, %v445_v43 }
 0x115   :  { %v558_v4 = vsel %vm526_vm8, 1, %v1330_v9  ;;  %vm639_vm14 = vcmp.lt.f32.partialorder %v1652_v20, %v1681_v22  ;;  %vm527_vm0 = vcmp.lt.f32.partialorder %v511_v55, %v446_v42  ;;  %v700_v37 = vrot.slane %v1389_v41, 7 }
 0x116   :  { %vm717_vm1 = vcmp.lt.s32.totalorder %v1666_v36, 1  ;;  %v1688_v18 = vmul.f32 %v610_v14, %v610_v14  ;;  %v1693_v52 = vsel %vm637_vm12, 2, %v556_v51  ;;  %v1695_v63 = vmul.f32 %v608_v40, %v608_v40 }
 0x117   :  { %v1700_v43 = vsel %vm641_vm9, 2, %v560_v32  ;;  %v1707_v34 = vsel %vm639_vm14, 2, %v558_v4  ;;  %vm529_vm2 = vcmp.lt.f32.partialorder %v513_v13, %v448_v38  ;;  %v699_v56 = vrot.slane %v1378_v15, 7 }
 0x118   :  { %v1715_v19 = vsel %vm527_vm0, %v511_v55, %v446_v42  ;;  %v1717_v25 = vsel %vm529_vm2, %v513_v13, %v448_v38  ;;  %v701_v1 = vrot.slane %v1413_v6, 7  ;;  %v561_v35 = vsel %vm529_vm2, 1, %v1330_v9 }
 0x119   :  { %874 = vrot.lane.b32.xlu1 %v1693_v52, %s1331_s0  ;;  %882 = vrot.lane.b32.xlu2 %v1700_v43, %s1331_s0  ;;  %v732_v30 = vsel %vm717_vm1, %v699_v56, %v700_v37  ;;  %vm1958_vm6 = vcmp.lt.f32.partialorder %v1688_v18, %v1717_v25  ;;  %v702_v45 = vrot.slane %v1446_v57, 7  ;;  %v559_v5 = vsel %vm527_vm0, 1, %v1330_v9 }
 0x11a   :  { %878 = vrot.lane.b32.xlu0 %v1707_v34, %s1331_s0  ;;  %vm640_vm7 = vcmp.lt.f32.partialorder %v1695_v63, %v1715_v19  ;;  %v1733_v59 = vsel %vm1958_vm6, 2, %v561_v35  ;;  %vm750_vm8 = vcmp.ne.s32.totalorder %v1389_v41, %v732_v30  ;;  %v731_v60 = vsel %vm717_vm1, %v700_v37, %v701_v1 }
 0x11b   :  { %v714_v46 = vrot.slane %v1733_v59, 7  ;;  %v703_v7 = vrot.slane %v1487_v8, 7  ;;  %vm765_vm2 = vcmp.ge.s32.totalorder %v1666_v36, 1  ;;  %v647_v9 = vsel %vm631_vm10, %v1469_v29, %v1471_v31 }
 0x11c   :  { %v1749_v49 = vsel %vm640_vm7, 2, %v559_v5  ;;  %v730_v42 = vsel %vm717_vm1, %v701_v1, %v702_v45  ;;  %v704_v55 = vrot.slane %v1554_v2, 7  ;;  %v1332_v29 = vmov 0.0  }
 0x11d   :  { %v733_v39 = vsel %vm717_vm1, %v714_v46, %v699_v56  ;;  %v1062_v31 = vsel %vm750_vm8, 1.0, %v1332_v29  ;;  %vm751_vm0 = vcmp.ne.s32.totalorder %v1413_v6, %v731_v60  ;;  %v648_v40 = vsel %vm632_vm13, %v1526_v23, %v1533_v28 }
 0x11e   :  { %vm749_vm10 = vcmp.ne.s32.totalorder %v1378_v15, %v733_v39  ;;  %v678_v14 = vadd.f32 %v1448_v58, %v647_v9  ;;  %v729_v38 = vsel %vm717_vm1, %v702_v45, %v703_v7  ;;  %v705_v13 = vrot.slane %v1591_v48, 7 }
 0x11f   :  { %vm781_vm6 = vmand %vm749_vm10, %vm765_vm2  ;;  %vm752_vm8 = vcmp.ne.s32.totalorder %v1446_v57, %v730_v42  ;;  %v649_v23 = vsel %vm633_vm15, %v1566_v53, %v1577_v62  ;;  %v1063_v51 = vsel %vm751_vm0, 1.0, %v1332_v29  ;;  %v728_v58 = vsel %vm717_vm1, %v703_v7, %v704_v55 }
 0x120   :  { %v1061_v32 = vsel %vm781_vm6, 1.0, %v1332_v29  ;;  %v679_v4 = vadd.f32 %v678_v14, %v648_v40  ;;  %v706_v37 = vrot.slane %v1638_v33, 7  ;;  %vm753_vm13 = vcmp.ne.s32.totalorder %v1487_v8, %v729_v38 }
 0x121   :  { %880 = vrot.lane.b32.xlu1 %v1749_v49, %s1331_s0  ;;  %v829_v28 = vadd.f32 %v1062_v31, %v1061_v32  ;;  %v650_v56 = vsel %vm634_vm5, %v1611_v47, %v1615_v16  ;;  %v1064_v53 = vsel %vm752_vm8, 1.0, %v1332_v29  ;;  %v727_v62 = vsel %vm717_vm1, %v704_v55, %v705_v13 }
 0x122   :  { %884 = vrot.lane.b32.xlu0 %v1733_v59, %s1331_s0  ;;  %v680_v35 = vadd.f32 %v679_v4, %v649_v23  ;;  %vm754_vm15 = vcmp.ne.s32.totalorder %v1554_v2, %v728_v58  ;;  %v707_v30 = vrot.slane %v1573_v27, 7  ;;  %v1065_v5 = vsel %vm753_vm13, 1.0, %v1332_v29 }
 0x123   :  { %v830_v1 = vadd.f32 %v1063_v51, %v829_v28  ;;  %v726_v60 = vsel %vm717_vm1, %v705_v13, %v706_v37  ;;  %v708_v47 = vrot.slane %v1650_v61, 7  ;;  %vm755_vm5 = vcmp.ne.s32.totalorder %v1591_v48, %v727_v62 }
 0x124   :  { %v681_v7 = vadd.f32 %v680_v35, %v650_v56  ;;  %v1066_v9 = vsel %vm754_vm15, 1.0, %v1332_v29  ;;  %v725_v39 = vsel %vm717_vm1, %v706_v37, %v707_v30  ;;  %v709_v42 = vrot.slane %v1693_v52, 7 }
 0x125   :  { %v831_v45 = vadd.f32 %v1064_v53, %v830_v1  ;;  %v651_v55 = vsel %vm635_vm11, %v1455_v12, %v1482_v50  ;;  %vm756_vm6 = vcmp.ne.s32.totalorder %v1638_v33, %v726_v60  ;;  %v1067_v40 = vsel %vm755_vm5, 1.0, %v1332_v29 }
 0x126   :  { %v710_v14 = vrot.slane %v1643_v54, 7  ;;  %v724_v38 = vsel %vm717_vm1, %v707_v30, %v708_v47  ;;  %v682_v13 = vadd.f32 %v681_v7, %v651_v55  ;;  %vm757_vm2 = vcmp.ne.s32.totalorder %v1573_v27, %v725_v39 }
 0x127   :  { %v832_v16 = vadd.f32 %v1065_v5, %v831_v45  ;;  %v1068_v23 = vsel %vm756_vm6, 1.0, %v1332_v29  ;;  %v723_v28 = vsel %vm717_vm1, %v708_v47, %v709_v42  ;;  %v711_v12 = vrot.slane %v1707_v34, 7 }
 0x128   :  { %v652_v50 = vsel %vm636_vm4, %v1506_v17, %v1607_v11  ;;  %vm758_vm11 = vcmp.ne.s32.totalorder %v1650_v61, %v724_v38  ;;  %v1069_v4 = vsel %vm757_vm2, 1.0, %v1332_v29  ;;  %v722_v37 = vsel %vm717_vm1, %v709_v42, %v710_v14 }
 0x129   :  { %v833_v31 = vadd.f32 %v1066_v9, %v832_v16  ;;  %v683_v58 = vadd.f32 %v682_v13, %v652_v50  ;;  %v712_v56 = vrot.slane %v1749_v49, 7  ;;  %vm759_vm10 = vcmp.ne.s32.totalorder %v1693_v52, %v723_v28 }
 0x12a   :  { %v1070_v53 = vsel %vm758_vm11, 1.0, %v1332_v29  ;;  %v713_v62 = vrot.slane %v1700_v43, 7  ;;  %v721_v17 = vsel %vm717_vm1, %v710_v14, %v711_v12  ;;  %v653_v11 = vsel %vm637_vm12, %v1632_v26, %v1672_v44 }
 0x12b   :  { %v834_v32 = vadd.f32 %v1067_v40, %v833_v31  ;;  %vm760_vm4 = vcmp.ne.s32.totalorder %v1643_v54, %v722_v37  ;;  %v1071_v30 = vsel %vm759_vm10, 1.0, %v1332_v29  ;;  %v684_v45 = vadd.f32 %v683_v58, %v653_v11 }
 0x12c   :  { %v720_v5 = vsel %vm717_vm1, %v711_v12, %v712_v56  ;;  %vm761_vm0 = vcmp.ne.s32.totalorder %v1707_v34, %v721_v17  ;;  %v719_v7 = vsel %vm717_vm1, %v712_v56, %v713_v62  ;;  %v1072_v47 = vsel %vm760_vm4, 1.0, %v1332_v29 }
 0x12d   :  { %v835_v51 = vadd.f32 %v1068_v23, %v834_v32  ;;  %v654_v26 = vsel %vm638_vm3, %v1561_v21, %v1599_v3  ;;  %vm762_vm12 = vcmp.ne.s32.totalorder %v1749_v49, %v720_v5  ;;  %v1073_v16 = vsel %vm761_vm0, 1.0, %v1332_v29 }
 0x12e   :  { %v685_v9 = vadd.f32 %v684_v45, %v654_v26  ;;  %v718_v39 = vsel %vm717_vm1, %v713_v62, %v714_v46  ;;  %vm763_vm8 = vcmp.ne.s32.totalorder %v1700_v43, %v719_v7  ;;  %v1074_v55 = vsel %vm762_vm12, 1.0, %v1332_v29 }
 0x12f   :  { %v836_v1 = vadd.f32 %v1069_v4, %v835_v51  ;;  %v655_v21 = vsel %vm639_vm14, %v1652_v20, %v1681_v22  ;;  %vm764_vm3 = vcmp.ne.s32.totalorder %v1733_v59, %v718_v39  ;;  %v1075_v31 = vsel %vm763_vm8, 1.0, %v1332_v29 }
 0x130   :  { %v686_v40 = vadd.f32 %v685_v9, %v655_v21  ;;  %v1076_v36 = vsel %vm764_vm3, 1.0, %v1332_v29  ;;  %v656_v46 = vsel %vm640_vm7, %v1695_v63, %v1715_v19  ;;  %v657_v20 = vsel %vm641_vm9, %v1654_v24, %v1663_v0 }
 0x131   :  { %v837_v35 = vadd.f32 %v1070_v53, %v836_v1  ;;  %vm1959_vm14 = vcmp.lt.f32.partialorder %v1688_v18, %v1717_v25  ;;  %v1885_v12 = vand.u32 127, %v715_v10 }
 0x132   :  { %v687_v13 = vadd.f32 %v686_v40, %v656_v46  ;;  %v658_v32 = vsel %vm1959_vm14, %v1688_v18, %v1717_v25 }
 0x133   :  { %v838_v60 = vadd.f32 %v1071_v30, %v837_v35  ;;  %vm904_vm9 = vcmp.ge.s32.totalorder %v1885_v12, 1 }
 0x134   :  { %v688_v22 = vadd.f32 %v687_v13, %v657_v20 }
 0x135   :  { %v839_v44 = vadd.f32 %v1072_v47, %v838_v60 }
 0x136   :  { %v689_v23 = vadd.f32 %v688_v22, %v658_v32 }
 0x137   :  { %v840_v42 = vadd.f32 %v1073_v16, %v839_v44 }
 0x139   :  { %v841_v3 = vadd.f32 %v1074_v55, %v840_v42 }
 0x13b   :  { %v842_v14 = vadd.f32 %v1075_v31, %v841_v3 }
 0x13d   :  { %v843_v38 = vadd.f32 %v1076_v36, %v842_v14 }
 0x142   :  { %844 = vadd.xlane.f32.xlu2 %v843_v38 }
 0x14b   :  { %690 = vadd.xlane.f32.xlu1 %v689_v23  ;;  %v855_v28 = vpop.permute.xlu0 %854 }
 0x14c   :  { %vm888_vm7 = vcmp.ne.s32.totalorder %v1378_v15, %v855_v28 }
 0x14d   :  { %vm905_vm5 = vmand %vm888_vm7, %vm904_vm9 }
 0x14e   :  { %v1077_v15 = vsel %vm905_vm5, 1.0, %v1332_v29 }
 0x153   :  { %v863_v19 = vpop.permute.xlu2 %862  ;;  %v857_v50 = vpop.permute.xlu0 %856 }
 0x154   :  { %vm889_vm1 = vcmp.ne.s32.totalorder %v1389_v41, %v857_v50  ;;  %vm892_vm10 = vcmp.ne.s32.totalorder %v1487_v8, %v863_v19 }
 0x155   :  { %vm906_vm15 = vmand %vm889_vm1, %vm904_vm9 }
 0x156   :  { %v1078_v41 = vsel %vm906_vm15, 1.0, %v1332_v29  ;;  %vm909_vm4 = vmand %vm892_vm10, %vm904_vm9 }
 0x157   :  { %v953_v10 = vadd.f32 %v1078_v41, %v1077_v15  ;;  %v1081_v58 = vsel %vm909_vm4, 1.0, %v1332_v29 }
 0x15b   :  { %v859_v63 = vpop.permute.xlu1 %858  ;;  %v865_v0 = vpop.permute.xlu2 %864 }
 0x15c   :  { %vm890_vm13 = vcmp.ne.s32.totalorder %v1413_v6, %v859_v63  ;;  %vm893_vm0 = vcmp.ne.s32.totalorder %v1554_v2, %v865_v0 }
 0x15d   :  { %vm907_vm2 = vmand %vm890_vm13, %vm904_vm9 }
 0x15e   :  { %v1079_v6 = vsel %vm907_vm2, 1.0, %v1332_v29  ;;  %vm910_vm8 = vmand %vm893_vm0, %vm904_vm9 }
 0x15f   :  { %v954_v25 = vadd.f32 %v1079_v6, %v953_v10  ;;  %v1082_v8 = vsel %vm910_vm8, 1.0, %v1332_v29 }
 0x163   :  { %v861_v24 = vpop.permute.xlu1 %860  ;;  %v871_v51 = vpop.permute.xlu2 %870 }
 0x164   :  { %vm891_vm6 = vcmp.ne.s32.totalorder %v1446_v57, %v861_v24  ;;  %vm896_vm14 = vcmp.ne.s32.totalorder %v1573_v27, %v871_v51 }
 0x165   :  { %vm908_vm11 = vmand %vm891_vm6, %vm904_vm9 }
 0x166   :  { %v1080_v18 = vsel %vm908_vm11, 1.0, %v1332_v29  ;;  %vm913_vm1 = vmand %vm896_vm14, %vm904_vm9 }
 0x167   :  { %v955_v57 = vadd.f32 %v1080_v18, %v954_v25  ;;  %v1085_v11 = vsel %vm913_vm1, 1.0, %v1332_v29 }
 0x169   :  { %v956_v37 = vadd.f32 %v1081_v58, %v955_v57 }
 0x16b   :  { %v957_v2 = vadd.f32 %v1082_v8, %v956_v37 }
 0x17b   :  { %v867_v4 = vpop.permute.xlu0 %866 }
 0x17c   :  { %vm894_vm12 = vcmp.ne.s32.totalorder %v1591_v48, %v867_v4  ;;  %v877_v48 = vpop.permute.xlu2 %876 }
 0x17d   :  { %vm911_vm3 = vmand %vm894_vm12, %vm904_vm9  ;;  %vm899_vm5 = vcmp.ne.s32.totalorder %v1643_v54, %v877_v48 }
 0x17e   :  { %v1083_v56 = vsel %vm911_vm3, 1.0, %v1332_v29  ;;  %vm916_vm2 = vmand %vm899_vm5, %vm904_vm9 }
 0x17f   :  { %v958_v62 = vadd.f32 %v1083_v56, %v957_v2  ;;  %v1088_v7 = vsel %vm916_vm2, 1.0, %v1332_v29 }
 0x183   :  { %v869_v1 = vpop.permute.xlu1 %868 }
 0x184   :  { %vm895_vm7 = vcmp.ne.s32.totalorder %v1638_v33, %v869_v1  ;;  %v873_v53 = vpop.permute.xlu0 %872 }
 0x185   :  { %vm912_vm13 = vmand %vm895_vm7, %vm904_vm9  ;;  %vm897_vm15 = vcmp.ne.s32.totalorder %v1650_v61, %v873_v53  ;;  %v883_v61 = vpop.permute.xlu2 %882 }
 0x186   :  { %v1084_v17 = vsel %vm912_vm13, 1.0, %v1332_v29  ;;  %vm914_vm6 = vmand %vm897_vm15, %vm904_vm9  ;;  %vm902_vm0 = vcmp.ne.s32.totalorder %v1700_v43, %v883_v61 }
 0x187   :  { %v959_v27 = vadd.f32 %v1084_v17, %v958_v62  ;;  %v1086_v33 = vsel %vm914_vm6, 1.0, %v1332_v29  ;;  %vm919_vm8 = vmand %vm902_vm0, %vm904_vm9 }
 0x188   :  { %v1091_v9 = vsel %vm919_vm8, 1.0, %v1332_v29 }
 0x189   :  { %v960_v35 = vadd.f32 %v1085_v11, %v959_v27 }
 0x18b   :  { %v875_v30 = vpop.permute.xlu1 %874  ;;  %v961_v5 = vadd.f32 %v1086_v33, %v960_v35 }
 0x18c   :  { %vm898_vm11 = vcmp.ne.s32.totalorder %v1693_v52, %v875_v30  ;;  %v879_v45 = vpop.permute.xlu0 %878 }
 0x18d   :  { %vm915_vm10 = vmand %vm898_vm11, %vm904_vm9  ;;  %vm900_vm4 = vcmp.ne.s32.totalorder %v1707_v34, %v879_v45 }
 0x18e   :  { %v1087_v54 = vsel %vm915_vm10, 1.0, %v1332_v29  ;;  %vm917_vm12 = vmand %vm900_vm4, %vm904_vm9 }
 0x18f   :  { %v962_v60 = vadd.f32 %v1087_v54, %v961_v5  ;;  %v1089_v26 = vsel %vm917_vm12, 1.0, %v1332_v29 }
 0x191   :  { %v963_v47 = vadd.f32 %v1088_v7, %v962_v60 }
 0x193   :  { %v881_v52 = vpop.permute.xlu1 %880  ;;  %v964_v16 = vadd.f32 %v1089_v26, %v963_v47 }
 0x194   :  { %vm901_vm3 = vcmp.ne.s32.totalorder %v1749_v49, %v881_v52  ;;  %v885_v44 = vpop.permute.xlu0 %884 }
 0x195   :  { %vm918_vm14 = vmand %vm901_vm3, %vm904_vm9  ;;  %vm903_vm1 = vcmp.ne.s32.totalorder %v1733_v59, %v885_v44 }
 0x196   :  { %v1090_v43 = vsel %vm918_vm14, 1.0, %v1332_v29  ;;  %vm920_vm7 = vmand %vm903_vm1, %vm904_vm9 }
 0x197   :  { %v965_v34 = vadd.f32 %v1090_v43, %v964_v16  ;;  %v1092_v42 = vsel %vm920_vm7, 1.0, %v1332_v29 }
 0x199   :  { %v966_v39 = vadd.f32 %v1091_v9, %v965_v34 }
 0x19b   :  { %v967_v55 = vadd.f32 %v1092_v42, %v966_v39 }
 0x19d   :  { %968 = vadd.xlane.f32.xlu0 %v967_v55 }
 0x1b5   :  { %v845_v49 = vpop.xlane.xlu2 %844 }
 0x1b6   :  { %v846_v21 = vrot.slane %v845_v49, 4 }
 0x1b8   :  { %v847_v3 = vadd.f32 %v846_v21, %v845_v49 }
 0x1ba   :  { %v848_v31 = vrot.slane %v847_v3, 2 }
 0x1bc   :  { %v849_v36 = vadd.f32 %v848_v31, %v847_v3 }
 0x1be   :  { %v691_v40 = vpop.xlane.xlu1 %690  ;;  %v850_v13 = vrot.slane %v849_v36, 1 }
 0x1bf   :  { %v692_v14 = vrot.slane %v691_v40, 4 }
 0x1c0   :  { %v851_v32 = vadd.f32 %v850_v13, %v849_v36 }
 0x1c1   :  { %v693_v59 = vadd.f32 %v692_v14, %v691_v40 }
 0x1c3   :  { %v694_v46 = vrot.slane %v693_v59, 2 }
 0x1c5   :  { %v695_v38 = vadd.f32 %v694_v46, %v693_v59 }
 0x1c7   :  { %v696_v20 = vrot.slane %v695_v38, 1 }
 0x1c9   :  { %v697_v22 = vadd.f32 %v696_v20, %v695_v38 }
 0x1cb   :  { %1242 = vpush %v697_v22 }
 0x1cc   :  { %1244 = vpush %v851_v32 }
 0x1fc   :  { %s1243_s1 = spop %1242 }
 0x1fd   :  { %s1245_s23 = spop %1244 }
 0x1fe   :  { %s853_s27 = sadd.f32 %s1245_s23, %s1243_s1 }
 0x210   :  { %v969_v23 = vpop.xlane.xlu0 %968 }
 0x211   :  { %v970_v29 = vrot.slane %v969_v23, 4 }
 0x213   :  { %v971_v28 = vadd.f32 %v970_v29, %v969_v23 }
 0x215   :  { %v972_v63 = vrot.slane %v971_v28, 2 }
 0x217   :  { %v973_v19 = vadd.f32 %v972_v63, %v971_v28 }
 0x219   :  { %v974_v12 = vrot.slane %v973_v19, 1 }
 0x21b   :  { %v975_v50 = vadd.f32 %v974_v12, %v973_v19 }
 0x21d   :  { %1246 = vpush %v975_v50 }
 0x24e   :  { %s1247_s28 = spop %1246 }
 0x24f   :  { %s977_s29 = sadd.f32 %s1247_s28, %s853_s27 }
 0x251   :  { %979 = sst [smem:[#allocation8]] %s977_s29 }
 0x252   :  { %988 = dma.smem_to_hbm %s1333_s30, 16, %s986_s26, [#allocation5]  }
 0x253   :  { %1322 = dma.done.wait [#allocation5], 16  }
 0x254   :  { %1323 = vsyncadd [#allocation5], 4294967280 }
 0x255   :  { %993 = sfence }
 0x256   :  { %994 = vsyncpa [#allocation4], 1 }
 0x257   :  { %995 = vsyncpa [#allocation7], 1 }
 0x258   :  { %996 = vsyncpa [#allocation5], 1 }

</bundles_post_ra>
